<compile_context>
chip_gen: v5e
topology: v5e:2x2
jax: 0.10.0
libtpu: 0.0.40
codegen_flags: <defaults>
</compile_context>

<pallas_src>
import jax
import jax.numpy as jnp
from jax.experimental import pallas as pl
from jax.experimental.pallas import tpu as pltpu


def _make_head_kernel(eps: float):
    def head_kernel(x_ref, g_ref, w_ref, o_ref):
        # x_ref: (1, d_model)        -- last token only (constant across grid)
        # g_ref: (1, d_model)        -- RMSNorm scale   (constant across grid)
        # w_ref: (tile_v, d_model)   -- W tile in natural (vocab, d_model) layout
        # o_ref: (1, tile_v)         -- logits tile (lane-dense)
        x_last = x_ref[...].astype(jnp.float32)                         # (1, d_model)
        ms = jnp.mean(x_last * x_last, axis=-1, keepdims=True)          # (1, 1)
        x_norm = x_last * jax.lax.rsqrt(ms + eps) * g_ref[...].astype(jnp.float32)
        # Feed the MXU in the weight's native dtype; accumulate in f32.
        o_ref[...] = jax.lax.dot_general(
            x_norm.astype(w_ref.dtype), w_ref[...],
            dimension_numbers=(((1,), (1,)), ((), ())),   # contract d_model dims
            preferred_element_type=jnp.float32,
        ).astype(o_ref.dtype)

    return head_kernel


def _auto_tile_v(d_model: int, vocab: int, w_itemsize: int,
                 target_bytes: int = 8 << 20) -> int:
    """Vocab tile ~8 MiB of weight per buffer, multiple of 128, <= 2048."""
    tv = (target_bytes // max(1, d_model * w_itemsize)) // 128 * 128
    tv = max(128, min(2048, tv))
    return min(tv, vocab)


def llama_head(x, norm_weight, w_output, *, eps: float = 1e-5, tile_v: int | None = None):
    """x: (seq, d_model); norm_weight: (d_model,); w_output: (vocab, d_model).

    Returns logits of shape (vocab,) == LlamaHead.forward(x) in the reference.
    """
    seq_len, d_model = x.shape
    vocab, d_model_w = w_output.shape
    assert d_model_w == d_model

    w_itemsize = jnp.dtype(w_output.dtype).itemsize
    x_itemsize = jnp.dtype(x.dtype).itemsize
    g_itemsize = jnp.dtype(norm_weight.dtype).itemsize

    if tile_v is None:
        tile_v = _auto_tile_v(d_model, vocab, w_itemsize)
    tile_v = min(tile_v, vocab)

    # Only the last row is ever used: slice it outside the kernel (tiny copy)
    # so the kernel never keeps seq*d_model resident in VMEM.
    x_last = x[seq_len - 1:seq_len, :]               # (1, d_model)
    g = norm_weight.reshape(1, d_model)              # (1, d_model)

    n_tiles = pl.cdiv(vocab, tile_v)                 # partial last tile is masked

    # Explicit VMEM budget: double-buffered W tile dominates; leave headroom.
    w_tile_bytes = tile_v * d_model * w_itemsize
    needed = 2 * (w_tile_bytes + d_model * x_itemsize
                  + d_model * g_itemsize + tile_v * x_itemsize)
    vmem_limit = int(min(max(needed * 3 // 2 + (4 << 20), 32 << 20), 96 << 20))

    cost = pl.CostEstimate(
        flops=2 * d_model * vocab,
        transcendentals=1,
        bytes_accessed=(vocab * d_model * w_itemsize          # whole weight (dominant)
                        + d_model * (x_itemsize + g_itemsize)  # one row + scale
                        + vocab * x_itemsize),                 # logits out
    )

    out = pl.pallas_call(
        _make_head_kernel(eps),
        out_shape=jax.ShapeDtypeStruct((1, vocab), x.dtype),
        grid_spec=pltpu.PrefetchScalarGridSpec(
            num_scalar_prefetch=0,
            grid=(n_tiles,),
            in_specs=[
                pl.BlockSpec((1, d_model), lambda j: (0, 0)),        # last-token row
                pl.BlockSpec((1, d_model), lambda j: (0, 0)),        # norm weight
                pl.BlockSpec((tile_v, d_model), lambda j: (j, 0)),   # W tile (no transpose)
            ],
            out_specs=pl.BlockSpec((1, tile_v), lambda j: (0, j)),
        ),
        compiler_params=pltpu.CompilerParams(
            dimension_semantics=("parallel",),    # lets v7x shard vocab tiles over 2 TCs
            vmem_limit_bytes=vmem_limit,
        ),
        cost_estimate=cost,
    )(x_last, g, w_output)
    return out.reshape(vocab)


def _reference(x, norm_weight, w_output, eps):
    xf = x.astype(jnp.float32)
    ms = jnp.mean(xf * xf, axis=-1, keepdims=True)
    xn = xf * jax.lax.rsqrt(ms + eps) * norm_weight.astype(jnp.float32)
    return (xn[-1] @ w_output.astype(jnp.float32).T).astype(x.dtype)


if __name__ == "__main__":
    # Small config consistent with the module: seq=8, d_model=32, vocab=256.
    seq_len, d_model, vocab = 8, 32, 256
    eps = 1e-5

    key = jax.random.PRNGKey(0)
    kx, kw, kg = jax.random.split(key, 3)
    x = jax.random.normal(kx, (seq_len, d_model), dtype=jnp.float32)
    # Non-trivial RMSNorm weight to exercise the scale path.
    norm_weight = 1.0 + 0.1 * jax.random.normal(kg, (d_model,), dtype=jnp.float32)
    w_output = jax.random.normal(kw, (vocab, d_model), dtype=jnp.float32) * 0.02

    logits = llama_head(x, norm_weight, w_output, eps=eps)
    logits = jax.block_until_ready(logits)

    ref = _reference(x, norm_weight, w_output, eps)
    assert logits.shape == (vocab,)
    assert jnp.allclose(logits, ref, atol=1e-4, rtol=1e-4), "mismatch vs reference"

    print("KERNEL_OK")
</pallas_src>

<mosaic_0001>
module attributes {stable_mosaic.version = 11 : i64} {
  func.func @head_kernel(%arg0: i32, %arg1: memref<1x32xf32, #tpu.memory_space<vmem>>, %arg2: memref<1x32xf32, #tpu.memory_space<vmem>>, %arg3: memref<256x32xf32, #tpu.memory_space<vmem>>, %arg4: memref<1x256xf32, #tpu.memory_space<vmem>>) attributes {dimension_semantics = [#tpu.dimension_semantics<parallel>], iteration_bounds = array<i64: 1>, scalar_prefetch = 0 : i64, scratch_operands = 0 : i64, tpu.core_type = #tpu.core_type<tc>, window_params = [{pipeline_mode = #tpu.pipeline_mode<synchronous>, transform_indices = @transform_0, window_bounds = array<i64: 1, 32>}, {pipeline_mode = #tpu.pipeline_mode<synchronous>, transform_indices = @transform_1, window_bounds = array<i64: 1, 32>}, {transform_indices = @transform_2, window_bounds = array<i64: 256, 32>}, {transform_indices = @transform_3, window_bounds = array<i64: 1, 256>}]} {
    %c0 = arith.constant 0 : index
    %c0_0 = arith.constant 0 : index
    %0 = vector.load %arg1[%c0, %c0_0] : memref<1x32xf32, #tpu.memory_space<vmem>>, vector<1x32xf32>
    %1 = arith.mulf %0, %0 : vector<1x32xf32>
    %cst = arith.constant dense<0.000000e+00> : vector<1xf32>
    %2 = vector.multi_reduction <add>, %1, %cst [1] : vector<1x32xf32> to vector<1xf32>
    %3 = vector.shape_cast %2 : vector<1xf32> to vector<1x1xf32>
    %cst_1 = arith.constant 3.200000e+01 : f32
    %4 = vector.broadcast %cst_1 : f32 to vector<1x1xf32>
    %5 = arith.divf %3, %4 : vector<1x1xf32>
    %cst_2 = arith.constant 9.99999974E-6 : f32
    %6 = vector.broadcast %cst_2 : f32 to vector<1x1xf32>
    %7 = arith.addf %5, %6 : vector<1x1xf32>
    %8 = math.rsqrt %7 : vector<1x1xf32>
    %9 = vector.broadcast %8 : vector<1x1xf32> to vector<1x32xf32>
    %10 = arith.mulf %0, %9 : vector<1x32xf32>
    %c0_3 = arith.constant 0 : index
    %c0_4 = arith.constant 0 : index
    %11 = vector.load %arg2[%c0_3, %c0_4] : memref<1x32xf32, #tpu.memory_space<vmem>>, vector<1x32xf32>
    %12 = arith.mulf %10, %11 : vector<1x32xf32>
    %c0_5 = arith.constant 0 : index
    %c0_6 = arith.constant 0 : index
    %13 = vector.load %arg3[%c0_5, %c0_6] : memref<256x32xf32, #tpu.memory_space<vmem>>, vector<256x32xf32>
    %cst_7 = arith.constant dense<0.000000e+00> : vector<1x256xf32>
    %14 = tpu.matmul %12, %13, %cst_7 {dimension_numbers = #tpu.dot_dimension_numbers<[1], [1], [0], [0], [0, 0, 1, 0], [], []>} : vector<1x32xf32>, vector<256x32xf32>, vector<1x256xf32> -> vector<1x256xf32>
    %c0_8 = arith.constant 0 : index
    %c0_9 = arith.constant 0 : index
    %15 = vector.load %arg4[%c0_8, %c0_9] : memref<1x256xf32, #tpu.memory_space<vmem>>, vector<1x256xf32>
    tpu.vector_store %arg4[%c0_8, %c0_9], %14 {strides = array<i32>} : memref<1x256xf32, #tpu.memory_space<vmem>>, vector<1x256xf32>,
    return
  }
  func.func @transform_0(%arg0: i32) -> (i32, i32) {
    %c0_i32 = arith.constant 0 : i32
    %c0_i32_0 = arith.constant 0 : i32
    %c0_i32_1 = arith.constant 0 : i32
    return %c0_i32, %c0_i32_0 : i32, i32
  }
  func.func @transform_1(%arg0: i32) -> (i32, i32) {
    %c0_i32 = arith.constant 0 : i32
    %c0_i32_0 = arith.constant 0 : i32
    %c0_i32_1 = arith.constant 0 : i32
    return %c0_i32, %c0_i32_0 : i32, i32
  }
  func.func @transform_2(%arg0: i32) -> (i32, i32) {
    %c0_i32 = arith.constant 0 : i32
    %c0_i32_0 = arith.constant 0 : i32
    return %arg0, %c0_i32 : i32, i32
  }
  func.func @transform_3(%arg0: i32) -> (i32, i32) {
    %c0_i32 = arith.constant 0 : i32
    %c0_i32_0 = arith.constant 0 : i32
    return %c0_i32, %arg0 : i32, i32
  }
}

</mosaic_0001>

<bundles_post_ra>
// kernel: tpu_custom_call.1
= control target key start
LH: loop header
LB: loop body
LE: loop exit
PB: predicated region body
PF: predicated region fallthrough
CT: control target
= control target key end

     0   :  { %vm17_vm0 = vcmask 253952   ;;  %vm75_vm1 = vcmask 261120   ;;  %s474_s0 = inlined_call_operand.vmem [shape: f32[1,32], index: 0, kind: input, shape index: {}]   ;;  %s475_s1 = inlined_call_operand.vmem [shape: f32[1,32], index: 1, kind: input, shape index: {}]   ;;  %s476_s2 = inlined_call_operand.vmem [shape: f32[256,32], index: 2, kind: input, shape index: {}]   ;;  %s477_s3 = inlined_call_operand.hbm [shape: f32[1,256], index: 3, kind: output, shape index: {}]  }
   0x1   :  { %v333_v0 = vld [vmem:[%s474_s0] sm:$0x1]  ;;  %v58_v1 = vld [vmem:[%s476_s2 + $0x78] sm:$0xff]  ;;  %v57_v4 = vld [vmem:[%s476_s2 + $0x70] sm:$0xff] }
   0x2   :  { %v74_v2 = vld [vmem:[%s476_s2 + $0xf8] sm:$0xff]  ;;  %v16_v3 = vmul.f32 %v333_v0, %v333_v0  ;;  %242 = vmatpush.xpose.msk.msra.mxu0 %vm75_vm1, %v58_v1  ;;  %v73_v5 = vld [vmem:[%s476_s2 + $0xf0] sm:$0xff]  ;;  %v56_v7 = vld [vmem:[%s476_s2 + $0x68] sm:$0xff] }
   0x3   :  { %259 = vmatpush.xpose.msk.msra.mxu1 %vm75_vm1, %v74_v2  ;;  %v72_v8 = vld [vmem:[%s476_s2 + $0xe8] sm:$0xff] }
   0x4   :  { %v18_v6 = vsel %vm17_vm0, %v16_v3, 0.0 }
   0x5   :  { %19 = vadd.xlane.f32.xlu0 %v18_v6 }
   0x6   :  { %243 = vmatpush.xpose.msk.msra.mxu0 %vm75_vm1, %v57_v4 }
   0x7   :  { %260 = vmatpush.xpose.msk.msra.mxu1 %vm75_vm1, %v73_v5 }
   0x8   :  { %8 = vsyncpa [#allocation3], 0  ;;  %v55_v9 = vld [vmem:[%s476_s2 + $0x60] sm:$0xff]  ;;  %v54_v11 = vld [vmem:[%s476_s2 + $0x58] sm:$0xff]  ;;  %v308_v25 = vmov 32.0   ;;  %v221_v55 = vlaneseq  ;;  %s309_s22 = smov [#allocation2]  }
   0x9   :  { %v71_v10 = vld [vmem:[%s476_s2 + $0xe0] sm:$0xff]  ;;  %v70_v12 = vld [vmem:[%s476_s2 + $0xd8] sm:$0xff]  ;;  %v53_v13 = vld [vmem:[%s476_s2 + $0x50] sm:$0xff]  ;;  %278 = vrcp.f32 %v308_v25  ;;  %s231_s23 = sshll.u32 %s309_s22, 4  ;;  %s233_s26 = sshll.u32 %s477_s3, 4  ;;  %vm218_vm6 = vcmask 1040384   ;;  %s232_s23 = int_to_ptr.vmem [resolvable:$true] %s231_s23  ;;  %s234_s26 = int_to_ptr.hbm [resolvable:$true] %s233_s26 }
   0xa   :  { %244 = vmatpush.xpose.msk.msra.mxu0 %vm75_vm1, %v56_v7  ;;  %v69_v14 = vld [vmem:[%s476_s2 + $0xd0] sm:$0xff]  ;;  %v52_v15 = vld [vmem:[%s476_s2 + $0x48] sm:$0xff]  ;;  %v51_v17 = vld [vmem:[%s476_s2 + $0x40] sm:$0xff]  ;;  %vm223_vm7 = vcmp.lt.s32.totalorder %v221_v55, 256 }
   0xb   :  { %261 = vmatpush.xpose.msk.msra.mxu1 %vm75_vm1, %v72_v8  ;;  %v68_v16 = vld [vmem:[%s476_s2 + $0xc8] sm:$0xff]  ;;  %v67_v18 = vld [vmem:[%s476_s2 + $0xc0] sm:$0xff]  ;;  %v50_v19 = vld [vmem:[%s476_s2 + $0x38] sm:$0xff] }
   0xc   :  { %v66_v20 = vld [vmem:[%s476_s2 + $0xb8] sm:$0xff]  ;;  %v49_v21 = vld [vmem:[%s476_s2 + $0x30] sm:$0xff]  ;;  %v48_v23 = vld [vmem:[%s476_s2 + $0x28] sm:$0xff] }
   0xd   :  { %v65_v22 = vld [vmem:[%s476_s2 + $0xb0] sm:$0xff]  ;;  %v64_v24 = vld [vmem:[%s476_s2 + $0xa8] sm:$0xff]  ;;  %v47_v26 = vld [vmem:[%s476_s2 + $0x20] sm:$0xff] }
   0xe   :  { %245 = vmatpush.xpose.msk.msra.mxu0 %vm75_vm1, %v55_v9  ;;  %v63_v27 = vld [vmem:[%s476_s2 + $0xa0] sm:$0xff]  ;;  %v46_v29 = vld [vmem:[%s476_s2 + $0x18] sm:$0xff]  ;;  %v45_v32 = vld [vmem:[%s476_s2 + $0x10] sm:$0xff] }
   0xf   :  { %262 = vmatpush.xpose.msk.msra.mxu1 %vm75_vm1, %v71_v10  ;;  %v279_v28 = vpop.eup %278  ;;  %v62_v30 = vld [vmem:[%s476_s2 + $0x98] sm:$0xff]  ;;  %v61_v33 = vld [vmem:[%s476_s2 + $0x90] sm:$0xff]  ;;  %v44_v35 = vld [vmem:[%s476_s2 + $0x8] sm:$0xff] }
  0x10   :  { %v22_v31 = vmul.f32 32.0, %v279_v28  ;;  %v60_v36 = vld [vmem:[%s476_s2 + $0x88] sm:$0xff]  ;;  %v43_v37 = vld [vmem:[%s476_s2] sm:$0xff]  ;;  %vm26_vm2 = vweird.f32 %v279_v28 }
  0x11   :  { %v59_v38 = vld [vmem:[%s476_s2 + $0x80] sm:$0xff] }
  0x12   :  { %246 = vmatpush.xpose.msk.msra.mxu0 %vm75_vm1, %v54_v11  ;;  %v23_v34 = vsub.f32 1.0, %v22_v31  ;;  %v41_v52 = vld [vmem:[%s475_s1] sm:$0x1] }
  0x13   :  { %263 = vmatpush.xpose.msk.msra.mxu1 %vm75_vm1, %v70_v12 }
  0x14   :  { %v24_v39 = vmul.f32 %v279_v28, %v23_v34 }
  0x16   :  { %247 = vmatpush.xpose.msk.msra.mxu0 %vm75_vm1, %v53_v13  ;;  %v25_v40 = vadd.f32 %v279_v28, %v24_v39 }
  0x17   :  { %264 = vmatpush.xpose.msk.msra.mxu1 %vm75_vm1, %v69_v14 }
  0x18   :  { %v27_v41 = vsel %vm26_vm2, %v279_v28, %v25_v40 }
  0x1a   :  { %248 = vmatpush.xpose.msk.msra.mxu0 %vm75_vm1, %v52_v15 }
  0x1b   :  { %265 = vmatpush.xpose.msk.msra.mxu1 %vm75_vm1, %v68_v16 }
  0x1e   :  { %249 = vmatpush.xpose.msk.msra.mxu0 %vm75_vm1, %v51_v17 }
  0x1f   :  { %266 = vmatpush.xpose.msk.msra.mxu1 %vm75_vm1, %v67_v18 }
  0x22   :  { %250 = vmatpush.xpose.msk.msra.mxu0 %vm75_vm1, %v50_v19 }
  0x23   :  { %267 = vmatpush.xpose.msk.msra.mxu1 %vm75_vm1, %v66_v20 }
  0x26   :  { %251 = vmatpush.xpose.msk.msra.mxu0 %vm75_vm1, %v49_v21 }
  0x27   :  { %268 = vmatpush.xpose.msk.msra.mxu1 %vm75_vm1, %v65_v22 }
  0x2a   :  { %252 = vmatpush.xpose.msk.msra.mxu0 %vm75_vm1, %v48_v23 }
  0x2b   :  { %269 = vmatpush.xpose.msk.msra.mxu1 %vm75_vm1, %v64_v24 }
  0x2e   :  { %253 = vmatpush.xpose.msk.msra.mxu0 %vm75_vm1, %v47_v26 }
  0x2f   :  { %270 = vmatpush.xpose.msk.msra.mxu1 %vm75_vm1, %v63_v27 }
  0x32   :  { %254 = vmatpush.xpose.msk.msra.mxu0 %vm75_vm1, %v46_v29 }
  0x33   :  { %271 = vmatpush.xpose.msk.msra.mxu1 %vm75_vm1, %v62_v30 }
  0x36   :  { %255 = vmatpush.xpose.msk.msra.mxu0 %vm75_vm1, %v45_v32 }
  0x37   :  { %272 = vmatpush.xpose.msk.msra.mxu1 %vm75_vm1, %v61_v33 }
  0x3a   :  { %256 = vmatpush.xpose.msk.msra.mxu0 %vm75_vm1, %v44_v35 }
  0x3b   :  { %273 = vmatpush.xpose.msk.msra.mxu1 %vm75_vm1, %v60_v36 }
  0x3e   :  { %257 = vmatpush.xpose.msk.msra.mxu0 %vm75_vm1, %v43_v37 }
  0x3f   :  { %274 = vmatpush.xpose.msk.msra.mxu1 %vm75_vm1, %v59_v38 }
  0x78   :  { %v20_v42 = vpop.xlane.xlu0 %19 }
  0x79   :  { %v28_v43 = vmul.f32 %v27_v41, %v20_v42 }
  0x7b   :  { %v29_v44 = vadd.f32 1e-05, %v28_v43 }
  0x7d   :  { %280 = vrsqrt.f32 %v29_v44  ;;  %vm36_vm4 = vweird.f32 %v29_v44 }
  0x83   :  { %v281_v45 = vpop.eup %280 }
  0x84   :  { %v31_v46 = vmul.f32 %v281_v45, %v29_v44  ;;  %vm37_vm3 = vweird.f32 %v281_v45 }
  0x85   :  { %vm38_vm5 = vmor %vm36_vm4, %vm37_vm3 }
  0x86   :  { %v32_v47 = vmul.f32 %v281_v45, %v31_v46 }
  0x88   :  { %v33_v48 = vmul.f32 0.5, %v32_v47 }
  0x8a   :  { %v34_v49 = vsub.f32 1.5, %v33_v48 }
  0x8c   :  { %v35_v50 = vmul.f32 %v281_v45, %v34_v49 }
  0x8e   :  { %v39_v51 = vsel %vm38_vm5, %v281_v45, %v35_v50 }
  0x8f   :  { %v40_v53 = vmul.f32 %v39_v51, %v333_v0 }
  0x91   :  { %v42_v54 = vmul.f32 %v41_v52, %v40_v53 }
  0x93   :  { %258 = vmatmul.msk.f32.vlgmr.msra.gmra.mxu0 %vm75_vm1, %v42_v54  ;;  %275 = vmatmul.msk.f32.vlgmr.msra.gmra.mxu1 %vm75_vm1, %v42_v54 }
 0x110   :  { %v212_v56 = vpop.f32.mrf.mxu1  ;;  %v192_v58 = vpop.f32.mrf.mxu0 }
 0x111   :  { %v217_v57 = vrot.slane %v212_v56, 7 }
 0x113   :  { %v219_v59 = vsel %vm218_vm6, %v192_v58, %v217_v57 }
 0x114   :  { %225 = vst.msk [vmem:[#allocation2] sm:$0x3] %vm223_vm7, %v219_v59 }
 0x115   :  { %236 = dma.vmem_to_hbm [thread:$0]  %s232_s23, 32, %s234_s26, [#allocation3]  }
 0x116   :  { %306 = dma.done.wait [#allocation3], 32  }
 0x117   :  { %307 = vsyncadd [#allocation3], 4294967264 }
 0x118   :  { %241 = vsyncpa [#allocation3], 1 }

</bundles_post_ra>
